<compile_context>
chip_gen: v7x
topology: tpu7x:2x2x1
jax: 0.10.0
libtpu: 0.0.40
codegen_flags: <defaults>
</compile_context>

<pallas_src>
import jax
import jax.numpy as jnp
from jax.experimental import pallas as pl
from jax.experimental.pallas import tpu as pltpu


def _pack_copy_kernel(x_ref, o_ref):
    """Whole-block, lane-dense copy: x_ref/o_ref are (ROW_TILE, g*D) VMEM tiles."""
    o_ref[...] = x_ref[...]


def _choose_row_tile(n_rows, row_bytes):
    """Pick a row-tile size for a memory-bound copy.

    ~4 MiB tiles (double-buffered in + out => ~16 MiB resident, safe for v7x's
    32 MiB scoped VMEM; tiny vs v5e/v6e's 128 MiB).  Prefer >= 2 grid steps when
    tiles stay >= ~0.5 MiB so v7x's two TensorCores both get work.
    """
    target_bytes = 4 << 20
    tile = min(n_rows, max(1, target_bytes // max(row_bytes, 1)))
    half = pl.cdiv(n_rows, 2)
    if tile >= n_rows and half * row_bytes >= (512 << 10):
        tile = half
    if tile >= n_rows:
        return n_rows                      # block == full extent: always legal
    # Partial tiling: second-to-last block dim must be a multiple of 8.
    tile = (tile // 8) * 8
    if tile < 8:
        return n_rows                      # too small to tile legally -> one block
    return tile


def pack_batch(x, group_size):
    """x: (B, L, D) -> (B * (L // group_size), group_size, D).

    Equivalent to einops rearrange(x, 'b (l g) d -> (b l) g d', g=group_size).
    """
    B, L, D = x.shape
    assert L % group_size == 0, (L, group_size)
    l = L // group_size
    new_b = B * l
    cols = group_size * D

    # Free, contiguous reshape: the bytes of 'b (l g) d' and '(b l) (g d)' are
    # identical in row-major order.  Present a lane-dense 2D view to the kernel.
    x2d = x.reshape(new_b, cols)

    row_bytes = cols * jnp.dtype(x.dtype).itemsize
    tile = _choose_row_tile(new_b, row_bytes)
    grid = (pl.cdiv(new_b, tile),)

    out2d = pl.pallas_call(
        _pack_copy_kernel,
        out_shape=jax.ShapeDtypeStruct((new_b, cols), x.dtype),
        grid=grid,
        in_specs=[pl.BlockSpec((tile, cols), lambda i: (i, 0))],
        out_specs=pl.BlockSpec((tile, cols), lambda i: (i, 0)),
        compiler_params=pltpu.CompilerParams(
            dimension_semantics=("parallel",)),
    )(x2d)

    # (new_b, g*D) -> (new_b, g, D): metadata-only reshape.
    return out2d.reshape(new_b, group_size, D)


if __name__ == "__main__":
    # Small shapes consistent with the module: x is ('BSZ', L, D) with
    # L % group_size == 0.  Pick B=2, L=8, D=32, group_size=4.
    B, L, D = 2, 8, 32
    group_size = 4

    key = jax.random.PRNGKey(0)
    x = jax.random.normal(key, (B, L, D), dtype=jnp.float32)

    y = pack_batch(x, group_size)
    jax.block_until_ready(y)

    # Reference: rearrange(x, 'b (l g) d -> (b l) g d', g=group_size), which is
    # exactly the row-major reshape below.
    l = L // group_size
    y_ref = x.reshape(B * l, group_size, D)

    assert y.shape == (B * l, group_size, D), y.shape
    assert y.dtype == x.dtype
    assert jnp.array_equal(y, y_ref), "mismatch vs reference rearrange"

    print("KERNEL_OK")
</pallas_src>

<mosaic_0001>
module attributes {stable_mosaic.version = 11 : i64} {
  func.func @_pack_copy_kernel(%arg0: i32, %arg1: memref<4x128xf32, #tpu.memory_space<vmem>>, %arg2: memref<4x128xf32, #tpu.memory_space<vmem>>) attributes {dimension_semantics = [#tpu.dimension_semantics<parallel>], iteration_bounds = array<i64: 1>, scalar_prefetch = 0 : i64, scratch_operands = 0 : i64, tpu.core_type = #tpu.core_type<tc>, window_params = [{transform_indices = @transform_0, window_bounds = array<i64: 4, 128>}, {transform_indices = @transform_1, window_bounds = array<i64: 4, 128>}]} {
    %c0 = arith.constant 0 : index
    %c0_0 = arith.constant 0 : index
    %0 = vector.load %arg1[%c0, %c0_0] : memref<4x128xf32, #tpu.memory_space<vmem>>, vector<4x128xf32>
    %c0_1 = arith.constant 0 : index
    %c0_2 = arith.constant 0 : index
    %1 = vector.load %arg2[%c0_1, %c0_2] : memref<4x128xf32, #tpu.memory_space<vmem>>, vector<4x128xf32>
    tpu.vector_store %arg2[%c0_1, %c0_2], %0 {strides = array<i32>} : memref<4x128xf32, #tpu.memory_space<vmem>>, vector<4x128xf32>,
    return
  }
  func.func @transform_0(%arg0: i32) -> (i32, i32) {
    %c0_i32 = arith.constant 0 : i32
    %c0_i32_0 = arith.constant 0 : i32
    return %arg0, %c0_i32 : i32, i32
  }
  func.func @transform_1(%arg0: i32) -> (i32, i32) {
    %c0_i32 = arith.constant 0 : i32
    %c0_i32_0 = arith.constant 0 : i32
    return %arg0, %c0_i32 : i32, i32
  }
}

</mosaic_0001>

<bundles_post_ra>
// kernel: tpu_custom_call.1
= control target key start
LH: loop header
LB: loop body
LE: loop exit
PB: predicated region body
PF: predicated region fallthrough
CT: control target
= control target key end

     0   :  { %6 = vsyncpa [#allocation3], 0  ;;  %s124_s0 = inlined_call_operand.hbm [shape: f32[4,128], index: 0, kind: input, shape index: {}]   ;;  %s125_s1 = inlined_call_operand.hbm [shape: f32[4,128], index: 1, kind: output, shape index: {}]  }
   0x1   :  { %7 = vsyncpa [#allocation4], 0  ;;  %s88_s6 = smov [#allocation2]   ;;  %s40_s10 = scalar_lea.hbm %s124_s0, 64 }
   0x2   :  { %s14_s7 = sshll.u32 %s88_s6, 4  ;;  %p41_p0 = scmp.ne.s32.totalorder %s124_s0, %s40_s10  ;;  %s15_s7 = int_to_ptr.vmem [resolvable:$true] %s14_s7 }
   0x3   :  { %p44_p1 = scmp.lt.u32.totalorder %s40_s10, %s124_s0 }
   0x5   :  { %p46_p2 = pnand %p44_p1, %p41_p0 }
   0x7   :  { %49 = shalt.err (!%p46_p2)
}
   0x8   :  { %s50_s15 = scalar_lea.vmem %s15_s7, 64  ;;  %p55_p4 = scmp.lt.s32.totalorder %s15_s7, %s15_s7 }
   0x9   :  { %p51_p3 = scmp.ne.s32.totalorder %s15_s7, %s50_s15  ;;  %p56_p5 = scmp.lt.s32.totalorder %s50_s15, %s50_s15 }
   0xb   :  { %p57_p6 = por %p56_p5, %p55_p4 }
   0xd   :  { %p58_p7 = pnand %p57_p6, %p51_p3 }
   0xf   :  { %61 = shalt.err (!%p58_p7)
}
  0x10   :  { %17 = dma.hbm_to_vmem [thread:$0]  %s124_s0, 64, %s15_s7, [#allocation3]  }
  0x11   :  { %84 = dma.done.wait [#allocation3], 64  }
  0x12   :  { %85 = vsyncadd [#allocation3], 4294967232  ;;  %s89_s18 = smov [#allocation5]   ;;  %v21_v0 = vld [vmem:[#allocation2] sm:$0xf] }
  0x13   :  { %s29_s19 = sshll.u32 %s89_s18, 4  ;;  %22 = vst [vmem:[#allocation5] sm:$0xf] %v21_v0  ;;  %s30_s19 = int_to_ptr.vmem [resolvable:$true] %s29_s19 }
  0x14   :  { %s62_s20 = scalar_lea.vmem %s30_s19, 64  ;;  %p67_p9 = scmp.lt.s32.totalorder %s30_s19, %s30_s19 }
  0x15   :  { %p63_p8 = scmp.ne.s32.totalorder %s30_s19, %s62_s20  ;;  %p68_p10 = scmp.lt.s32.totalorder %s62_s20, %s62_s20 }
  0x17   :  { %p69_p11 = por %p68_p10, %p67_p9 }
  0x19   :  { %p70_p12 = pnand %p69_p11, %p63_p8 }
  0x1b   :  { %73 = shalt.err (!%p70_p12)
}
  0x1c   :  { %s74_s23 = scalar_lea.hbm %s125_s1, 64 }
  0x1d   :  { %p75_p13 = scmp.ne.s32.totalorder %s125_s1, %s74_s23  ;;  %p78_p0 = scmp.lt.u32.totalorder %s74_s23, %s125_s1 }
  0x1f   :  { %p80_p1 = pnand %p78_p0, %p75_p13 }
  0x21   :  { %83 = shalt.err (!%p80_p1)
}
  0x22   :  { %32 = dma.vmem_to_hbm [thread:$0]  %s30_s19, 64, %s125_s1, [#allocation4]  }
  0x23   :  { %86 = dma.done.wait [#allocation4], 64  }
  0x24   :  { %87 = vsyncadd [#allocation4], 4294967232 }
  0x25   :  { %36 = vsyncpa [#allocation3], 1 }
  0x26   :  { %37 = vsyncpa [#allocation4], 1 }

</bundles_post_ra>
